<compile_context>
chip_gen: v7x
topology: tpu7x:2x2x1
jax: 0.10.0
libtpu: 0.0.40
codegen_flags: <defaults>
</compile_context>

<pallas_src>
import functools

import jax
import jax.numpy as jnp
from jax.experimental import pallas as pl
from jax.experimental.pallas import tpu as pltpu

ALPHA = 0.25
GAMMA = 2
LANES = 128
DEFAULT_TILE_ROWS = 4096   # rows/step for 4-byte inputs (auto-scaled for narrower dtypes)
DEFAULT_NUM_SPLITS = 1     # 1 TensorCore on v5e/v6e; pass 2 on 2-TC parts (v7x)


def _focal_kernel(x_ref, t_ref, o_ref, *, alpha, gamma, n_valid,
                  blocks_per_split, tile_r, last_block, needs_mask):
    j = pl.program_id(1)

    @pl.when(j == 0)
    def _():
        o_ref[...] = jnp.zeros_like(o_ref)

    x = x_ref[...].astype(jnp.float32)   # cast in-register; HBM keeps native dtype
    t = t_ref[...].astype(jnp.float32)

    # Numerically stable binary_cross_entropy_with_logits (reduction='none'):
    #   bce = max(x, 0) - x*t + log1p(exp(-|x|))
    e = jnp.exp(-jnp.abs(x))
    bce = jnp.maximum(x, 0.0) - x * t + jnp.log1p(e)

    # pt = exp(-bce) = sigmoid(x) if t==1 else 1-sigmoid(x); recover (1 - pt)
    # directly, without a second exp:
    #   (1 - pt) = [1 if sign(x) disagrees with t else e] / (1 + e)
    t_pos = t >= 0.5
    disagree = jnp.logical_xor(x >= 0.0, t_pos)
    denom = 1.0 + e
    # Approx reciprocal = single EUP push; one Newton step restores f32 accuracy.
    r = pl.reciprocal(denom, approx=True)
    r = r * (2.0 - denom * r)
    one_minus_pt = jnp.where(disagree, jnp.float32(1.0), e) * r

    # at = alpha.gather(0, targets.long()) with alpha = [alpha, 1 - alpha]
    # (binary {0,1} targets, same contract as the PyTorch module).
    at = jnp.where(t_pos, jnp.float32(1.0 - alpha), jnp.float32(alpha))
    focal = at * one_minus_pt ** gamma * bce   # gamma is a Python int -> VPU multiplies

    if needs_mask:
        blk = pl.program_id(0) * blocks_per_split + j
        is_boundary = blk == last_block

        @pl.when(jnp.logical_not(is_boundary))
        def _():
            # Interior blocks: no mask math at all.
            o_ref[...] += jnp.sum(focal, axis=0, keepdims=True)

        @pl.when(is_boundary)
        def _():
            # Only the globally-last block can contain padded / over-read
            # elements; derive validity in-kernel (no mask stream from HBM).
            # Keep this a select (not a multiply) so garbage in the padded
            # region cannot propagate NaNs.
            base = blk * (tile_r * LANES)
            ridx = jax.lax.broadcasted_iota(jnp.int32, focal.shape, 0)
            lidx = jax.lax.broadcasted_iota(jnp.int32, focal.shape, 1)
            valid = (base + ridx * LANES + lidx) < n_valid
            o_ref[...] += jnp.sum(jnp.where(valid, focal, 0.0), axis=0,
                                  keepdims=True)
    else:
        o_ref[...] += jnp.sum(focal, axis=0, keepdims=True)


def weighted_focal_loss(inputs, targets, alpha=ALPHA, gamma=GAMMA,
                        *, tile_rows=DEFAULT_TILE_ROWS,
                        num_splits=DEFAULT_NUM_SPLITS):
    """Pallas equivalent of WeightedFocalLoss.forward (returns scalar mean).

    Targets must be binary {0,1} but may be passed in any dtype (bf16 / int8 /
    f32); they stay narrow in HBM and are cast to f32 in-register.
    """
    x = jnp.reshape(inputs, (-1,))
    t = jnp.reshape(targets, (-1,))
    n = x.shape[0]

    # View as a lane-major (rows, 128) slab.  Pad only the ragged tail row
    # (n % 128); if n is already a multiple of 128 this is a free reshape.
    rows = pl.cdiv(n, LANES)
    lane_pad = rows * LANES - n
    if lane_pad:
        x = jnp.pad(x, (0, lane_pad))
        t = jnp.pad(t, (0, lane_pad))
    x2 = x.reshape(rows, LANES)
    t2 = t.reshape(rows, LANES)

    # Scale the row tile so bytes/step stay constant for narrow dtypes
    # (bf16 -> 2x rows, int8 -> 4x rows); round to a multiple of 32 so any
    # sublane packing ((8|16|32) x 128) stays unmasked.
    itemsize = int(jnp.dtype(x2.dtype).itemsize)
    eff_tile_rows = int(tile_rows) * max(1, 4 // max(itemsize, 1))
    if rows <= eff_tile_rows:
        tile_r = rows                       # one block == full array (always legal)
    else:
        tile_r = max(32, (eff_tile_rows // 32) * 32)
    total_blocks = pl.cdiv(rows, tile_r)

    # Take the requested split only when it divides the block count evenly;
    # otherwise fall back to one split (no phantom blocks, no index clamping).
    n_split = int(num_splits)
    if n_split < 1 or total_blocks < n_split or total_blocks % n_split != 0:
        n_split = 1
    blocks_per_split = total_blocks // n_split

    # Mask is only needed when the grid over-covers the true element count,
    # and then only the globally-last block can contain invalid elements.
    needs_mask = (total_blocks * tile_r * LANES) != n

    in_spec = pl.BlockSpec(
        (tile_r, LANES),
        lambda s, j, bps=blocks_per_split: (s * bps + j, 0))

    g = float(gamma)
    gamma_static = int(g) if g.is_integer() else g

    kernel = functools.partial(
        _focal_kernel,
        alpha=float(alpha),
        gamma=gamma_static,
        n_valid=int(n),
        blocks_per_split=int(blocks_per_split),
        tile_r=int(tile_r),
        last_block=int(total_blocks - 1),
        needs_mask=bool(needs_mask),
    )

    # Double-buffered inputs dominate VMEM: 2 buffers x (x tile + t tile).
    tile_in_bytes = tile_r * LANES * (x2.dtype.itemsize + t2.dtype.itemsize)
    vmem_limit = int(min(max(2 * tile_in_bytes + (2 << 20), 16 << 20), 48 << 20))

    partials = pl.pallas_call(
        kernel,
        out_shape=jax.ShapeDtypeStruct((n_split, LANES), jnp.float32),
        grid=(n_split, blocks_per_split),
        in_specs=[in_spec, in_spec],
        out_specs=pl.BlockSpec((1, LANES), lambda s, j: (s, 0)),
        compiler_params=pltpu.CompilerParams(
            dimension_semantics=("parallel", "arbitrary"),
            vmem_limit_bytes=vmem_limit),
    )(x2, t2)

    # Final cross-lane / cross-split reduce and mean normalization (done once,
    # in f32, which also improves summation precision for large N).
    return jnp.sum(partials) / n


def _reference(inputs, targets, alpha=ALPHA, gamma=GAMMA):
    """Direct translation of the PyTorch module (f32)."""
    x = inputs.astype(jnp.float32)
    t = targets.astype(jnp.float32)
    bce = jnp.maximum(x, 0.0) - x * t + jnp.log1p(jnp.exp(-jnp.abs(x)))
    at = jnp.where(t >= 0.5, 1.0 - alpha, alpha)
    pt = jnp.exp(-bce)
    return jnp.mean(at * (1.0 - pt) ** gamma * bce)


if __name__ == "__main__":
    key = jax.random.PRNGKey(0)
    k1, k2, k3, k4, k5, k6 = jax.random.split(key, 6)

    # Case 1: small ragged 1-D batch of binary logits (single-block path,
    # boundary-only tail masking).
    n1 = 1000
    x1 = jax.random.normal(k1, (n1,), dtype=jnp.float32) * 2.0
    t1 = jax.random.bernoulli(k2, p=0.3, shape=(n1,)).astype(jnp.float32)
    loss1 = jax.block_until_ready(weighted_focal_loss(x1, t1))
    ref1 = _reference(x1, t1)
    assert jnp.allclose(loss1, ref1, rtol=1e-4, atol=1e-6), (loss1, ref1)

    # Case 2: multi-block serial grid with a ragged last block (tile_rows is
    # shrunk only to exercise the multi-tile + boundary-mask path at small N).
    n2 = 40_000
    x2 = jax.random.normal(k3, (n2,), dtype=jnp.float32) * 2.0
    t2 = jax.random.bernoulli(k4, p=0.5, shape=(n2,)).astype(jnp.float32)
    loss2 = jax.block_until_ready(weighted_focal_loss(x2, t2, tile_rows=64))
    ref2 = _reference(x2, t2)
    assert jnp.allclose(loss2, ref2, rtol=1e-4, atol=1e-6), (loss2, ref2)

    # Case 3: bf16 logits + narrow bf16 targets, exact block coverage, and an
    # explicit 2-way split (no-op parallelism on 1-TC chips, per-core on v7x).
    n3 = 65_536
    x3 = (jax.random.normal(k5, (n3,), dtype=jnp.float32) * 2.0).astype(jnp.bfloat16)
    t3 = jax.random.bernoulli(k6, p=0.4, shape=(n3,)).astype(jnp.bfloat16)
    loss3 = jax.block_until_ready(
        weighted_focal_loss(x3, t3, tile_rows=128, num_splits=2))
    ref3 = _reference(x3, t3)
    assert jnp.allclose(loss3, ref3, rtol=1e-4, atol=1e-6), (loss3, ref3)

    print("KERNEL_OK")
</pallas_src>

<mosaic_0001>
module attributes {stable_mosaic.version = 11 : i64} {
  func.func @_focal_kernel(%arg0: i32, %arg1: i32, %arg2: memref<8x128xf32, #tpu.memory_space<vmem>>, %arg3: memref<8x128xf32, #tpu.memory_space<vmem>>, %arg4: memref<1x128xf32, #tpu.memory_space<vmem>>) attributes {dimension_semantics = [#tpu.dimension_semantics<parallel>, #tpu.dimension_semantics<arbitrary>], iteration_bounds = array<i64: 1, 1>, scalar_prefetch = 0 : i64, scratch_operands = 0 : i64, tpu.core_type = #tpu.core_type<tc>, window_params = [{transform_indices = @transform_0, window_bounds = array<i64: 8, 128>}, {transform_indices = @transform_1, window_bounds = array<i64: 8, 128>}, {transform_indices = @transform_2, window_bounds = array<i64: 1, 128>}]} {
    %c0_i32 = arith.constant 0 : i32
    %0 = arith.cmpi eq, %arg1, %c0_i32 : i32
    %1 = arith.extui %0 : i1 to i32
    %c0_i32_0 = arith.constant 0 : i32
    %2 = arith.cmpi ne, %1, %c0_i32_0 : i32
    scf.if %2 {
      %cst_15 = arith.constant 0.000000e+00 : f32
      %44 = vector.broadcast %cst_15 : f32 to vector<1x128xf32>
      %c0_16 = arith.constant 0 : index
      %c0_17 = arith.constant 0 : index
      %45 = vector.load %arg4[%c0_16, %c0_17] : memref<1x128xf32, #tpu.memory_space<vmem>>, vector<1x128xf32>
      tpu.vector_store %arg4[%c0_16, %c0_17], %44 {strides = array<i32>} : memref<1x128xf32, #tpu.memory_space<vmem>>, vector<1x128xf32>,
    } else {
    }
    %c0 = arith.constant 0 : index
    %c0_1 = arith.constant 0 : index
    %3 = vector.load %arg2[%c0, %c0_1] : memref<8x128xf32, #tpu.memory_space<vmem>>, vector<8x128xf32>
    %c0_2 = arith.constant 0 : index
    %c0_3 = arith.constant 0 : index
    %4 = vector.load %arg3[%c0_2, %c0_3] : memref<8x128xf32, #tpu.memory_space<vmem>>, vector<8x128xf32>
    %5 = math.absf %3 : vector<8x128xf32>
    %cst = arith.constant 0.000000e+00 : f32
    %6 = vector.broadcast %cst : f32 to vector<8x128xf32>
    %7 = arith.subf %6, %5 : vector<8x128xf32>
    %8 = math.exp %7 : vector<8x128xf32>
    %cst_4 = arith.constant 0.000000e+00 : f32
    %9 = vector.broadcast %cst_4 : f32 to vector<8x128xf32>
    %10 = arith.maximumf %3, %9 : vector<8x128xf32>
    %11 = arith.mulf %3, %4 : vector<8x128xf32>
    %12 = arith.subf %10, %11 : vector<8x128xf32>
    %13 = math.log1p %8 : vector<8x128xf32>
    %14 = arith.addf %12, %13 : vector<8x128xf32>
    %cst_5 = arith.constant 5.000000e-01 : f32
    %15 = vector.broadcast %cst_5 : f32 to vector<8x128xf32>
    %16 = arith.cmpf oge, %4, %15 : vector<8x128xf32>
    %cst_6 = arith.constant 0.000000e+00 : f32
    %17 = vector.broadcast %cst_6 : f32 to vector<8x128xf32>
    %18 = arith.cmpf oge, %3, %17 : vector<8x128xf32>
    %19 = arith.xori %18, %16 : vector<8x128xi1>
    %cst_7 = arith.constant 1.000000e+00 : f32
    %20 = vector.broadcast %cst_7 : f32 to vector<8x128xf32>
    %21 = arith.addf %20, %8 : vector<8x128xf32>
    %22 = tpu.reciprocal %21 {approx = true} : vector<8x128xf32> -> vector<8x128xf32>
    %23 = arith.mulf %21, %22 : vector<8x128xf32>
    %cst_8 = arith.constant 2.000000e+00 : f32
    %24 = vector.broadcast %cst_8 : f32 to vector<8x128xf32>
    %25 = arith.subf %24, %23 : vector<8x128xf32>
    %26 = arith.mulf %22, %25 : vector<8x128xf32>
    %cst_9 = arith.constant 1.000000e+00 : f32
    %27 = vector.broadcast %cst_9 : f32 to vector<8x128xf32>
    %28 = arith.select %19, %27, %8 : vector<8x128xi1>, vector<8x128xf32>
    %29 = arith.mulf %28, %26 : vector<8x128xf32>
    %cst_10 = arith.constant 7.500000e-01 : f32
    %cst_11 = arith.constant 2.500000e-01 : f32
    %30 = vector.broadcast %cst_10 : f32 to vector<8x128xf32>
    %31 = vector.broadcast %cst_11 : f32 to vector<8x128xf32>
    %32 = arith.select %16, %30, %31 : vector<8x128xi1>, vector<8x128xf32>
    %33 = arith.mulf %29, %29 : vector<8x128xf32>
    %34 = arith.mulf %32, %33 : vector<8x128xf32>
    %35 = arith.mulf %34, %14 : vector<8x128xf32>
    %c1_i32 = arith.constant 1 : i32
    %36 = arith.muli %arg0, %c1_i32 : i32
    %37 = arith.addi %36, %arg1 : i32
    %c0_i32_12 = arith.constant 0 : i32
    %38 = arith.cmpi eq, %37, %c0_i32_12 : i32
    %true = arith.constant true
    %39 = arith.xori %38, %true : i1
    %40 = arith.extui %39 : i1 to i32
    %c0_i32_13 = arith.constant 0 : i32
    %41 = arith.cmpi ne, %40, %c0_i32_13 : i32
    scf.if %41 {
      %c0_15 = arith.constant 0 : index
      %c0_16 = arith.constant 0 : index
      %44 = vector.load %arg4[%c0_15, %c0_16] : memref<1x128xf32, #tpu.memory_space<vmem>>, vector<1x128xf32>
      %cst_17 = arith.constant dense<0.000000e+00> : vector<128xf32>
      %45 = vector.multi_reduction <add>, %35, %cst_17 [0] : vector<8x128xf32> to vector<128xf32>
      %46 = vector.shape_cast %45 : vector<128xf32> to vector<1x128xf32>
      %47 = arith.addf %44, %46 : vector<1x128xf32>
      %c0_18 = arith.constant 0 : index
      %c0_19 = arith.constant 0 : index
      %48 = vector.load %arg4[%c0_18, %c0_19] : memref<1x128xf32, #tpu.memory_space<vmem>>, vector<1x128xf32>
      tpu.vector_store %arg4[%c0_18, %c0_19], %47 {strides = array<i32>} : memref<1x128xf32, #tpu.memory_space<vmem>>, vector<1x128xf32>,
    } else {
    }
    %42 = arith.extui %38 : i1 to i32
    %c0_i32_14 = arith.constant 0 : i32
    %43 = arith.cmpi ne, %42, %c0_i32_14 : i32
    scf.if %43 {
      %c1024_i32 = arith.constant 1024 : i32
      %44 = arith.muli %37, %c1024_i32 : i32
      %45 = tpu.iota {dimensions = array<i32: 0>} : vector<8x128xi32>
      %46 = tpu.iota {dimensions = array<i32: 1>} : vector<8x128xi32>
      %c128_i32 = arith.constant 128 : i32
      %47 = vector.broadcast %c128_i32 : i32 to vector<8x128xi32>
      %48 = arith.muli %45, %47 : vector<8x128xi32>
      %49 = vector.broadcast %44 : i32 to vector<8x128xi32>
      %50 = arith.addi %49, %48 : vector<8x128xi32>
      %51 = arith.addi %50, %46 : vector<8x128xi32>
      %c1000_i32 = arith.constant 1000 : i32
      %52 = vector.broadcast %c1000_i32 : i32 to vector<8x128xi32>
      %53 = arith.cmpi slt, %51, %52 : vector<8x128xi32>
      %c0_15 = arith.constant 0 : index
      %c0_16 = arith.constant 0 : index
      %54 = vector.load %arg4[%c0_15, %c0_16] : memref<1x128xf32, #tpu.memory_space<vmem>>, vector<1x128xf32>
      %cst_17 = arith.constant 0.000000e+00 : f32
      %55 = vector.broadcast %cst_17 : f32 to vector<8x128xf32>
      %56 = arith.select %53, %35, %55 : vector<8x128xi1>, vector<8x128xf32>
      %cst_18 = arith.constant dense<0.000000e+00> : vector<128xf32>
      %57 = vector.multi_reduction <add>, %56, %cst_18 [0] : vector<8x128xf32> to vector<128xf32>
      %58 = vector.shape_cast %57 : vector<128xf32> to vector<1x128xf32>
      %59 = arith.addf %54, %58 : vector<1x128xf32>
      %c0_19 = arith.constant 0 : index
      %c0_20 = arith.constant 0 : index
      %60 = vector.load %arg4[%c0_19, %c0_20] : memref<1x128xf32, #tpu.memory_space<vmem>>, vector<1x128xf32>
      tpu.vector_store %arg4[%c0_19, %c0_20], %59 {strides = array<i32>} : memref<1x128xf32, #tpu.memory_space<vmem>>, vector<1x128xf32>,
    } else {
    }
    return
  }
  func.func @transform_0(%arg0: i32, %arg1: i32) -> (i32, i32) {
    %c1_i32 = arith.constant 1 : i32
    %0 = arith.muli %arg0, %c1_i32 : i32
    %1 = arith.addi %0, %arg1 : i32
    %c0_i32 = arith.constant 0 : i32
    %c0_i32_0 = arith.constant 0 : i32
    return %1, %c0_i32 : i32, i32
  }
  func.func @transform_1(%arg0: i32, %arg1: i32) -> (i32, i32) {
    %c1_i32 = arith.constant 1 : i32
    %0 = arith.muli %arg0, %c1_i32 : i32
    %1 = arith.addi %0, %arg1 : i32
    %c0_i32 = arith.constant 0 : i32
    %c0_i32_0 = arith.constant 0 : i32
    return %1, %c0_i32 : i32, i32
  }
  func.func @transform_2(%arg0: i32, %arg1: i32) -> (i32, i32) {
    %c0_i32 = arith.constant 0 : i32
    %c0_i32_0 = arith.constant 0 : i32
    return %arg0, %c0_i32 : i32, i32
  }
}

</mosaic_0001>

<bundles_post_ra>
// kernel: tpu_custom_call.1
= control target key start
LH: loop header
LB: loop body
LE: loop exit
PB: predicated region body
PF: predicated region fallthrough
CT: control target
= control target key end

     0   :  { %7 = vsyncpa [#allocation3], 0  ;;  %s277_s0 = inlined_call_operand.hbm [shape: f32[8,128], index: 0, kind: input, shape index: {}]   ;;  %s278_s1 = inlined_call_operand.hbm [shape: f32[8,128], index: 1, kind: input, shape index: {}]   ;;  %s279_s2 = inlined_call_operand.hbm [shape: f32[1,128], index: 2, kind: output, shape index: {}]  }
   0x1   :  { %8 = vsyncpa [#allocation6], 0 }
   0x2   :  { %9 = vsyncpa [#allocation4], 0  ;;  %s219_s9 = smov [#allocation2]   ;;  %s220_s11 = smov [#allocation5]  }
   0x3   :  { %s19_s10 = sshll.u32 %s219_s9, 4  ;;  %s32_s12 = sshll.u32 %s220_s11, 4  ;;  %s20_s10 = int_to_ptr.vmem [resolvable:$true] %s19_s10  ;;  %s33_s12 = int_to_ptr.vmem [resolvable:$true] %s32_s12 }
   0x4   :  { %s147_s15 = scalar_lea.hbm %s277_s0, 128 }
   0x5   :  { %p148_p0 = scmp.ne.s32.totalorder %s277_s0, %s147_s15  ;;  %p151_p1 = scmp.lt.u32.totalorder %s147_s15, %s277_s0 }
   0x7   :  { %p153_p2 = pnand %p151_p1, %p148_p0 }
   0x9   :  { %156 = shalt.err (!%p153_p2)
}
   0xa   :  { %s157_s20 = scalar_lea.vmem %s20_s10, 128  ;;  %p162_p4 = scmp.lt.s32.totalorder %s20_s10, %s20_s10 }
   0xb   :  { %p158_p3 = scmp.ne.s32.totalorder %s20_s10, %s157_s20  ;;  %p163_p5 = scmp.lt.s32.totalorder %s157_s20, %s157_s20 }
   0xd   :  { %p164_p6 = por %p163_p5, %p162_p4 }
   0xf   :  { %p165_p7 = pnand %p164_p6, %p158_p3 }
  0x11   :  { %168 = shalt.err (!%p165_p7)
}
  0x12   :  { %22 = dma.hbm_to_vmem [thread:$0]  %s277_s0, 128, %s20_s10, [#allocation3]  }
  0x13   :  { %s169_s25 = scalar_lea.hbm %s278_s1, 128 }
  0x14   :  { %p170_p8 = scmp.ne.s32.totalorder %s278_s1, %s169_s25  ;;  %p173_p9 = scmp.lt.u32.totalorder %s169_s25, %s278_s1 }
  0x16   :  { %p175_p10 = pnand %p173_p9, %p170_p8 }
  0x18   :  { %178 = shalt.err (!%p175_p10)
}
  0x19   :  { %s179_s30 = scalar_lea.vmem %s33_s12, 128  ;;  %p184_p12 = scmp.lt.s32.totalorder %s33_s12, %s33_s12 }
  0x1a   :  { %p180_p11 = scmp.ne.s32.totalorder %s33_s12, %s179_s30  ;;  %p185_p13 = scmp.lt.s32.totalorder %s179_s30, %s179_s30 }
  0x1c   :  { %p186_p0 = por %p185_p13, %p184_p12 }
  0x1e   :  { %p187_p1 = pnand %p186_p0, %p180_p11 }
  0x20   :  { %190 = shalt.err (!%p187_p1)
}
  0x21   :  { %35 = dma.hbm_to_vmem [thread:$0]  %s278_s1, 128, %s33_s12, [#allocation6]  }
  0x22   :  { %213 = dma.done.wait [#allocation3], 128  }
  0x23   :  { %214 = vsyncadd [#allocation3], 4294967168 }
  0x24   :  { %215 = dma.done.wait [#allocation6], 128  }
  0x25   :  { %216 = vsyncadd [#allocation6], 4294967168  ;;  %v221_v0 = vmov 0.0   ;;  %v49_v1 = vld [vmem:[#allocation2] sm:$0xff]  ;;  %v50_v8 = vld [vmem:[#allocation5] sm:$0xff]  ;;  %v101_v9 = vlaneseq  ;;  %v222_v28 = vmov 0.25  }
  0x26   :  { %48 = vst [vmem:[#allocation7] sm:$0x1] %v221_v0  ;;  %v51_v2 = vand.u32 2147483647, %v49_v1  ;;  %vm68_vm0 = vcmp.ge.f32.partialorder %v50_v8, 0.5  ;;  %vm69_vm1 = vcmp.ge.f32.partialorder %v49_v1, 0.0  ;;  %v56_v16 = vmul.f32 %v50_v8, %v49_v1 }
  0x27   :  { %v102_v14 = vshrl.u32 %v101_v9, 7  ;;  %v55_v15 = vmax.f32 %v49_v1, 0.0  ;;  %vm70_vm2 = vmxor %vm69_vm1, %vm68_vm0  ;;  %v104_v22 = vand.u32 127, %v101_v9  ;;  %v78_v29 = vsel %vm68_vm0, 0.75, %v222_v28  ;;  %s223_s1 = smov [#allocation7]  }
  0x28   :  { %v52_v3 = vsub.f32 0.0, %v51_v2  ;;  %s126_s4 = sshll.u32 %s223_s1, 4  ;;  %s127_s4 = int_to_ptr.vmem [resolvable:$true] %s126_s4 }
  0x29   :  { %v105_v23 = vmul.u32 128, %v102_v14  ;;  %v57_v24 = vsub.f32 %v55_v15, %v56_v16  ;;  %s191_s5 = scalar_lea.vmem %s127_s4, 16  ;;  %s195_s6 = scalar_lea.vmem %s127_s4, 32 }
  0x2a   :  { %v53_v4 = vmul.f32 1.442695, %v52_v3  ;;  %p192_p2 = scmp.ne.s32.totalorder %s127_s4, %s191_s5  ;;  %p196_p3 = scmp.lt.s32.totalorder %s127_s4, %s127_s4 }
  0x2b   :  { %v108_v30 = vadd.s32 %v105_v23, %v104_v22  ;;  %p197_p4 = scmp.lt.s32.totalorder %s195_s6, %s191_s5 }
  0x2c   :  { %141 = vpow2.f32 %v53_v4 }
  0x2d   :  { %vm109_vm4 = vcmp.lt.s32.totalorder %v108_v30, 1000  ;;  %v110_v41 = vld [vmem:[#allocation7] sm:$0x1]  ;;  %p198_p5 = por %p197_p4, %p196_p3 }
  0x2f   :  { %p199_p6 = pnand %p198_p5, %p192_p2 }
  0x36   :  { %v142_v5 = vpop.eup %141 }
  0x37   :  { %v58_v6 = vadd.f32 1.0, %v142_v5  ;;  %v61_v7 = vmul.f32 -0.5, %v142_v5  ;;  %v64_v12 = vand.u32 2147483647, %v142_v5  ;;  %v76_v21 = vsel %vm70_vm2, 1.0, %v142_v5 }
  0x39   :  { %143 = vlog2.f32 %v58_v6  ;;  %v62_v10 = vadd.f32 1.0, %v61_v7  ;;  %vm65_vm3 = vcmp.lt.f32.partialorder %v64_v12, 0.0004427343 }
  0x3a   :  { %145 = vrcp.f32 %v58_v6 }
  0x3b   :  { %v63_v19 = vmul.f32 %v142_v5, %v62_v10 }
  0x43   :  { %v144_v11 = vpop.eup %143 }
  0x44   :  { %v146_v13 = vpop.eup %145  ;;  %v60_v18 = vmul.f32 0.6931472, %v144_v11 }
  0x45   :  { %v73_v17 = vmul.f32 %v146_v13, %v58_v6 }
  0x46   :  { %v66_v26 = vsel %vm65_vm3, %v63_v19, %v60_v18 }
  0x47   :  { %v74_v20 = vsub.f32 2.0, %v73_v17  ;;  %v67_v31 = vadd.f32 %v66_v26, %v57_v24 }
  0x49   :  { %v75_v25 = vmul.f32 %v146_v13, %v74_v20 }
  0x4b   :  { %v77_v27 = vmul.f32 %v76_v21, %v75_v25 }
  0x4d   :  { %v79_v32 = vmul.f32 %v77_v27, %v77_v27 }
  0x4f   :  { %v80_v33 = vmul.f32 %v79_v32, %v78_v29 }
  0x51   :  { %v81_v34 = vmul.f32 %v80_v33, %v67_v31 }
  0x53   :  { %v111_v35 = vsel %vm109_vm4, %v81_v34, 0.0 }
  0x54   :  { %v112_v36 = vrot.slane %v111_v35, 4 }
  0x56   :  { %v113_v37 = vadd.f32 %v112_v36, %v111_v35 }
  0x58   :  { %v114_v38 = vrot.slane %v113_v37, 2 }
  0x5a   :  { %v115_v39 = vadd.f32 %v114_v38, %v113_v37 }
  0x5c   :  { %v116_v40 = vrot.slane %v115_v39, 1 }
  0x5e   :  { %v117_v42 = vadd.f32 %v116_v40, %v115_v39 }
  0x60   :  { %v118_v43 = vadd.f32 %v117_v42, %v110_v41 }
  0x62   :  { %119 = vst [vmem:[#allocation7] sm:$0x1] %v118_v43 }
  0x63   :  { %202 = shalt.err (!%p199_p6)
}
  0x64   :  { %s203_s9 = scalar_lea.hbm %s279_s2, 16 }
  0x65   :  { %p204_p7 = scmp.ne.s32.totalorder %s279_s2, %s203_s9  ;;  %p207_p8 = scmp.lt.u32.totalorder %s203_s9, %s279_s2 }
  0x67   :  { %p209_p9 = pnand %p207_p8, %p204_p7 }
  0x69   :  { %212 = shalt.err (!%p209_p9)
}
  0x6a   :  { %129 = dma.vmem_to_hbm [thread:$0]  %s127_s4, 16, %s279_s2, [#allocation4]  }
  0x6b   :  { %217 = dma.done.wait [#allocation4], 16  }
  0x6c   :  { %218 = vsyncadd [#allocation4], 4294967280 }
  0x6d   :  { %133 = vsyncpa [#allocation3], 1 }
  0x6e   :  { %134 = vsyncpa [#allocation6], 1 }
  0x6f   :  { %135 = vsyncpa [#allocation4], 1 }

</bundles_post_ra>
